<compile_context>
chip_gen: v5e
topology: v5e:2x2
jax: 0.10.0
libtpu: 0.0.40
codegen_flags: <defaults>
</compile_context>

<pallas_src>
import functools

import jax
import jax.numpy as jnp
import numpy as np
from jax.experimental import pallas as pl
from jax.experimental.pallas import tpu as pltpu


def _round_up(x, m):
    return ((x + m - 1) // m) * m


def _agg_kernel(a_ref, hs_ref, w1_ref, b1_ref, w2_ref, b2_ref, out_ref, *,
                tb, K, Rp):
    """One grid step == one tile of `tb` batch elements (batch-major layout).

    a_ref  : [Ap, N]         compute dtype; rows 0..K-1 are the 0/1 cluster
                             indicators, row K is e_n, remaining rows are zero.
    hs_ref : [tb, N, h]      compute dtype (streaming input tile)
    w1_ref : [h, ghp]        compute dtype (zero-padded to a 128-lane multiple)
    b1_ref : [1, ghp]        float32
    w2_ref : [ghp, gdp]      compute dtype
    b2_ref : [1, gdp]        float32
    out_ref: [tb, K+1, gdp]  output dtype
    """
    A = a_ref[...]
    w1 = w1_ref[...]
    b1 = b1_ref[...]
    w2 = w2_ref[...]
    b2 = b2_ref[...]
    cd = w1.dtype
    Ap = A.shape[0]
    h, ghp = w1.shape
    gdp = w2.shape[1]
    R = 2 * K + 1

    # 1) Aggregation: the K cluster sums plus hs[:, n] for every batch element
    #    in the tile.  A is 0/1 (exact in bf16); accumulation is f32 on the
    #    MXU.  Ap is a multiple of 8, so the stacked result is tile-aligned
    #    and the subsequent 3D<->2D reshapes are layout-preserving.
    hc = jnp.stack(
        [jnp.dot(A, hs_ref[b], preferred_element_type=jnp.float32)
         for b in range(tb)],
        axis=0)                                           # [tb, Ap, h] f32

    # 2) MLP layer 1 on the K+1 aggregated rows only (single big-M matmul).
    #    The 2K+1 candidate H rows are sums of these rows and Linear-1 is
    #    linear, so the candidate pre-activations are formed with VPU adds.
    p = jnp.dot(hc.reshape(tb * Ap, h).astype(cd), w1,
                preferred_element_type=jnp.float32)       # [tb*Ap, ghp] f32
    p = p.reshape(tb, Ap, ghp)
    pc = p[:, :K, :]                                      # clusters  [tb, K, ghp]
    pn = p[:, K:K + 1, :]                                 # the point [tb, 1, ghp]
    pieces = [pc, pc + pn, pn]                            # candidate rows 0..2K
    if Rp > R:                                            # sublane padding rows
        pieces.append(jnp.zeros((tb, Rp - R, ghp), jnp.float32))
    z = jnp.concatenate(pieces, axis=1).reshape(tb * Rp, ghp)
    a1 = jnp.maximum(z + b1, 0.0)                         # [tb*Rp, ghp] f32

    # 3) MLP layer 2 over all candidate rows (single big-M matmul).
    gs = jnp.dot(a1.astype(cd), w2, preferred_element_type=jnp.float32) + b2
    gs = gs.reshape(tb, Rp, gdp)                          # [tb, Rp, gdp] f32

    # 4) G combination on the VPU: exact exclusive prefix/suffix sums over the
    #    K cluster rows (no kron matmul, no "total minus one term").
    rows = [gs[:, r, :] for r in range(R)]                # each [tb, gdp]
    zero = jnp.zeros_like(rows[0])
    prefix = [zero]                                       # prefix[j] = sum rows[<j]
    for j in range(K):
        prefix.append(prefix[j] + rows[j])
    suffix = [zero] * (K + 1)                             # suffix[j] = sum rows[j..K-1]
    for j in range(K - 1, -1, -1):
        suffix[j] = suffix[j + 1] + rows[j]
    g_list = [prefix[k] + suffix[k + 1] + rows[K + k] for k in range(K)]
    g_list.append(prefix[K] + rows[2 * K])
    out_ref[...] = jnp.stack(g_list, axis=1).astype(out_ref.dtype)  # [tb, K+1, gdp]


def _tpu_vmem_caps():
    """Returns (vmem_limit_cap_bytes, preferred_min_grid_steps)."""
    try:
        vmem = pltpu.get_tpu_info().vmem_capacity_bytes
    except Exception:
        vmem = 64 << 20
    if vmem <= (64 << 20):
        # v7x-class: 64 MiB per TensorCore, 2 TCs/chip -> keep headroom for
        # Mosaic scratch and leave >=2 grid steps per core for DMA overlap.
        return 52 << 20, 4
    # v5e / v6e: 128 MiB physical -> allow ~100 MiB scoped.
    return 100 << 20, 2


def _tile_footprint_bytes(tb, *, N, h_dim, ghp, gdp, Ap, Rp, K1, cbytes,
                          out_bytes):
    """Conservative per-step VMEM footprint for a batch tile of size tb."""
    hs_blk = 2 * tb * N * h_dim * cbytes                  # double-buffered input
    out_blk = 2 * tb * K1 * gdp * out_bytes               # double-buffered output
    consts = ((Ap * N + h_dim * ghp + ghp * gdp) * cbytes
              + (ghp + gdp) * 4)                          # single-buffered
    inter = tb * (Ap * h_dim + Ap * ghp + 2 * Rp * ghp + Rp * gdp
                  + K1 * gdp) * 4                         # f32 intermediates
    return hs_blk + out_blk + consts + inter


def _pick_batch_tile(batch, min_steps, footprint_fn, budget_bytes):
    """Largest divisor of `batch` whose footprint fits the budget, preferring
    tiles that leave at least `min_steps` grid steps."""
    divs = sorted(d for d in range(1, batch + 1) if batch % d == 0)
    fitting = [d for d in divs if footprint_fn(d) <= budget_bytes]
    if not fitting:
        return 1
    preferred = [d for d in fitting if batch // d >= min_steps]
    return max(preferred) if preferred else max(fitting)


def aggregate_clustered_sum(hs, cs_o, n, g_params, *,
                            compute_dtype=jnp.bfloat16,
                            out_dtype=jnp.float32,
                            batch_tile=None,
                            vmem_limit_bytes=None):
    """Default (training) path of AggregateClusteredSum.forward.

    hs       : [B, N, h_dim] float array
    cs_o     : [B, N] int labels.  MUST be host/numpy (K is derived statically).
    n        : python int index of the point being assigned
    g_params : (w1 [h_dim, gh], b1 [gh], w2 [gh, g_dim], b2 [g_dim])
    Returns (G [B, K+1, g_dim] in out_dtype, G_mask [B, K+1] float32).
    """
    w1, b1, w2, b2 = g_params
    B, N, h_dim = hs.shape
    gh = w1.shape[1]
    g_dim = w2.shape[1]
    n = int(n)

    # --- host-side glue: mask assignments, derive the static cluster count K.
    cs = np.asarray(cs_o, dtype=np.int32).copy()
    cs[:, n:] = -1
    K = int(cs.max()) + 1
    assert K >= 1, "need at least one assigned cluster (n must be > 0)"
    if not np.all(cs == cs[0:1]):
        raise NotImplementedError(
            "cs_is_sample=True (per-row cluster patterns) is not implemented; "
            "the default path requires identical label rows.")
    cs0 = cs[0]

    # Padded sizes: aggregation rows to the 8-sublane granule, MLP widths to
    # the 128-lane granule (lane-dense matmuls and output stores).
    Ap = _round_up(K + 1, 8)
    Rp = _round_up(2 * K + 1, 8)
    ghp = _round_up(gh, 128)
    gdp = _round_up(g_dim, 128)
    K1 = K + 1

    # Aggregation matrix: rows 0..K-1 are cluster indicators, row K is e_n.
    A = np.zeros((Ap, N), dtype=np.float32)
    for k in range(K):
        A[k, :] = (cs0 == k)
    A[K, n] = 1.0

    # Zero-padded MLP parameters (padding contributes exact zeros end to end).
    w1p = np.zeros((h_dim, ghp), np.float32)
    w1p[:, :gh] = np.asarray(w1, np.float32)
    b1p = np.zeros((1, ghp), np.float32)
    b1p[0, :gh] = np.asarray(b1, np.float32)
    w2p = np.zeros((ghp, gdp), np.float32)
    w2p[:gh, :g_dim] = np.asarray(w2, np.float32)
    b2p = np.zeros((1, gdp), np.float32)
    b2p[0, :g_dim] = np.asarray(b2, np.float32)

    cbytes = jnp.dtype(compute_dtype).itemsize
    obytes = jnp.dtype(out_dtype).itemsize
    limit_cap, min_steps = _tpu_vmem_caps()
    footprint = functools.partial(
        _tile_footprint_bytes, N=N, h_dim=h_dim, ghp=ghp, gdp=gdp, Ap=Ap,
        Rp=Rp, K1=K1, cbytes=cbytes, out_bytes=obytes)
    if batch_tile is None:
        batch_tile = _pick_batch_tile(B, min_steps, footprint,
                                      int(limit_cap * 0.8))
    tb = int(batch_tile)
    assert B % tb == 0, "batch_tile must divide the batch size"
    num_tiles = B // tb

    if vmem_limit_bytes is None:
        vmem_limit_bytes = min(limit_cap,
                               max(32 << 20,
                                   int(footprint(tb) * 1.5) + (4 << 20)))

    hs_c = jnp.asarray(hs, compute_dtype)
    a_c = jnp.asarray(A, compute_dtype)                  # 0/1 -> exact in bf16
    w1_c = jnp.asarray(w1p, compute_dtype)
    w2_c = jnp.asarray(w2p, compute_dtype)
    b1_f = jnp.asarray(b1p, jnp.float32)
    b2_f = jnp.asarray(b2p, jnp.float32)

    kernel = functools.partial(_agg_kernel, tb=tb, K=K, Rp=Rp)
    const = pl.Buffered(1)          # step-invariant operands: single VMEM buffer

    out = pl.pallas_call(
        kernel,
        out_shape=jax.ShapeDtypeStruct((B, K1, gdp), out_dtype),
        grid=(num_tiles,),
        in_specs=[
            pl.BlockSpec((Ap, N), lambda i: (0, 0), pipeline_mode=const),      # A
            pl.BlockSpec((tb, N, h_dim), lambda i: (i, 0, 0)),                 # hs tile
            pl.BlockSpec((h_dim, ghp), lambda i: (0, 0), pipeline_mode=const), # w1
            pl.BlockSpec((1, ghp), lambda i: (0, 0), pipeline_mode=const),     # b1
            pl.BlockSpec((ghp, gdp), lambda i: (0, 0), pipeline_mode=const),   # w2
            pl.BlockSpec((1, gdp), lambda i: (0, 0), pipeline_mode=const),     # b2
        ],
        out_specs=pl.BlockSpec((tb, K1, gdp), lambda i: (i, 0, 0)),
        compiler_params=pltpu.CompilerParams(
            dimension_semantics=("parallel",),
            vmem_limit_bytes=int(vmem_limit_bytes)),
    )(a_c, hs_c, w1_c, b1_f, w2_c, b2_f)

    G = out[:, :, :g_dim]                                # drop lane padding
    G_mask = jnp.ones((B, K1), dtype=jnp.float32)
    return G, G_mask


def _reference(hs, cs_row, n, K, w1, b1, w2, b2):
    """Pure-numpy port of the PyTorch default path (for verification)."""
    hs = np.asarray(hs, np.float64)
    w1 = np.asarray(w1, np.float64); b1 = np.asarray(b1, np.float64)
    w2 = np.asarray(w2, np.float64); b2 = np.asarray(b2, np.float64)
    B, N, h_dim = hs.shape
    g_dim = w2.shape[1]
    H = np.zeros((B, 2 * K + 1, h_dim))
    for k in range(K):
        mask = (cs_row[0] == k).astype(np.float64)[None, :, None]
        H[:, k, :] = (hs * mask).sum(1)
        H[:, k + K, :] = H[:, k, :] + hs[:, n, :]
    H[:, 2 * K, :] = hs[:, n, :]
    a = np.maximum(H @ w1 + b1, 0.0)
    gs = a @ w2 + b2
    G = np.zeros((B, K + 1, g_dim))
    for k in range(K):
        inds = np.array([True] * K + [False] * (K + 1))
        inds[k] = False
        inds[k + K] = True
        G[:, k, :] = gs[:, inds, :].sum(1)
    inds = np.array([True] * K + [False] * K + [True])
    G[:, K, :] = gs[:, inds, :].sum(1)
    G_mask = np.ones((B, K + 1))
    return G, G_mask


if __name__ == "__main__":
    # Small, deterministic example shapes.
    B, N = 8, 8
    h_dim, g_hidden, g_dim = 32, 32, 16
    n = 6  # index of the point to assign

    key = jax.random.PRNGKey(0)
    k_hs, k_w1, k_b1, k_w2, k_b2 = jax.random.split(key, 5)

    hs = jax.random.normal(k_hs, (B, N, h_dim), dtype=jnp.float32)

    # Ground-truth-style assignments (identical rows, labels increasing).
    cs_o = np.tile(np.array([0, 0, 1, 1, 2, 2, 3, 3], dtype=np.int32), (B, 1))

    # Parameters of g: Linear(h_dim, g_hidden) -> ReLU -> Linear(g_hidden, g_dim)
    w1 = jax.random.normal(k_w1, (h_dim, g_hidden), dtype=jnp.float32) * 0.1
    b1 = jax.random.normal(k_b1, (g_hidden,), dtype=jnp.float32) * 0.1
    w2 = jax.random.normal(k_w2, (g_hidden, g_dim), dtype=jnp.float32) * 0.1
    b2 = jax.random.normal(k_b2, (g_dim,), dtype=jnp.float32) * 0.1

    # Reference (f64 numpy port of the PyTorch forward).
    cs_masked = np.array(cs_o).copy()
    cs_masked[:, n:] = -1
    K = int(cs_masked.max()) + 1
    G_ref, G_mask_ref = _reference(np.asarray(hs), cs_masked[0:1], n, K,
                                   w1, b1, w2, b2)

    # f32-MXU path: tight tolerance.
    G32, M32 = aggregate_clustered_sum(hs, cs_o, n, (w1, b1, w2, b2),
                                       compute_dtype=jnp.float32)
    G32 = jax.block_until_ready(G32)
    M32 = jax.block_until_ready(M32)
    np.testing.assert_allclose(np.asarray(G32), G_ref, rtol=5e-4, atol=5e-4)
    np.testing.assert_allclose(np.asarray(M32), G_mask_ref, rtol=0, atol=0)

    # Default bf16-MXU path (full MXU rate, half the hs HBM bytes): relaxed tol.
    Gbf, Mbf = aggregate_clustered_sum(hs, cs_o, n, (w1, b1, w2, b2))
    Gbf = jax.block_until_ready(Gbf)
    Mbf = jax.block_until_ready(Mbf)
    np.testing.assert_allclose(np.asarray(Gbf), G_ref, rtol=5e-2, atol=5e-2)
    np.testing.assert_allclose(np.asarray(Mbf), G_mask_ref, rtol=0, atol=0)

    print("KERNEL_OK")
</pallas_src>

<mosaic_0001>
module attributes {stable_mosaic.version = 11 : i64} {
  func.func @_agg_kernel(%arg0: i32, %arg1: memref<8x8xf32, #tpu.memory_space<vmem>>, %arg2: memref<2x8x32xf32, #tpu.memory_space<vmem>>, %arg3: memref<32x128xf32, #tpu.memory_space<vmem>>, %arg4: memref<1x128xf32, #tpu.memory_space<vmem>>, %arg5: memref<128x128xf32, #tpu.memory_space<vmem>>, %arg6: memref<1x128xf32, #tpu.memory_space<vmem>>, %arg7: memref<2x4x128xf32, #tpu.memory_space<vmem>>) attributes {dimension_semantics = [#tpu.dimension_semantics<parallel>], iteration_bounds = array<i64: 4>, scalar_prefetch = 0 : i64, scratch_operands = 0 : i64, tpu.core_type = #tpu.core_type<tc>, window_params = [{pipeline_mode = #tpu.pipeline_mode<synchronous>, transform_indices = @transform_0, window_bounds = array<i64: 8, 8>}, {transform_indices = @transform_1, window_bounds = array<i64: 2, 8, 32>}, {pipeline_mode = #tpu.pipeline_mode<synchronous>, transform_indices = @transform_2, window_bounds = array<i64: 32, 128>}, {pipeline_mode = #tpu.pipeline_mode<synchronous>, transform_indices = @transform_3, window_bounds = array<i64: 1, 128>}, {pipeline_mode = #tpu.pipeline_mode<synchronous>, transform_indices = @transform_4, window_bounds = array<i64: 128, 128>}, {pipeline_mode = #tpu.pipeline_mode<synchronous>, transform_indices = @transform_5, window_bounds = array<i64: 1, 128>}, {transform_indices = @transform_6, window_bounds = array<i64: 2, 4, 128>}]} {
    %c0 = arith.constant 0 : index
    %c0_0 = arith.constant 0 : index
    %0 = vector.load %arg1[%c0, %c0_0] : memref<8x8xf32, #tpu.memory_space<vmem>>, vector<8x8xf32>
    %c0_1 = arith.constant 0 : index
    %c0_2 = arith.constant 0 : index
    %1 = vector.load %arg3[%c0_1, %c0_2] : memref<32x128xf32, #tpu.memory_space<vmem>>, vector<32x128xf32>
    %c0_3 = arith.constant 0 : index
    %c0_4 = arith.constant 0 : index
    %2 = vector.load %arg4[%c0_3, %c0_4] : memref<1x128xf32, #tpu.memory_space<vmem>>, vector<1x128xf32>
    %c0_5 = arith.constant 0 : index
    %c0_6 = arith.constant 0 : index
    %3 = vector.load %arg5[%c0_5, %c0_6] : memref<128x128xf32, #tpu.memory_space<vmem>>, vector<128x128xf32>
    %c0_7 = arith.constant 0 : index
    %c0_8 = arith.constant 0 : index
    %4 = vector.load %arg6[%c0_7, %c0_8] : memref<1x128xf32, #tpu.memory_space<vmem>>, vector<1x128xf32>
    %c0_9 = arith.constant 0 : index
    %c0_10 = arith.constant 0 : index
    %c0_11 = arith.constant 0 : index
    %5 = vector.load %arg2[%c0_9, %c0_10, %c0_11] : memref<2x8x32xf32, #tpu.memory_space<vmem>>, vector<1x8x32xf32>
    %6 = vector.shape_cast %5 : vector<1x8x32xf32> to vector<8x32xf32>
    %cst = arith.constant dense<0.000000e+00> : vector<8x32xf32>
    %7 = tpu.matmul %0, %6, %cst {dimension_numbers = #tpu.dot_dimension_numbers<[1], [0], [0], [1], [0, 0, 1, 1], [], []>} : vector<8x8xf32>, vector<8x32xf32>, vector<8x32xf32> -> vector<8x32xf32>
    %c1 = arith.constant 1 : index
    %c0_12 = arith.constant 0 : index
    %c0_13 = arith.constant 0 : index
    %8 = vector.load %arg2[%c1, %c0_12, %c0_13] : memref<2x8x32xf32, #tpu.memory_space<vmem>>, vector<1x8x32xf32>
    %9 = vector.shape_cast %8 : vector<1x8x32xf32> to vector<8x32xf32>
    %cst_14 = arith.constant dense<0.000000e+00> : vector<8x32xf32>
    %10 = tpu.matmul %0, %9, %cst_14 {dimension_numbers = #tpu.dot_dimension_numbers<[1], [0], [0], [1], [0, 0, 1, 1], [], []>} : vector<8x8xf32>, vector<8x32xf32>, vector<8x32xf32> -> vector<8x32xf32>
    %11 = vector.shape_cast %7 : vector<8x32xf32> to vector<1x8x32xf32>
    %12 = vector.shape_cast %10 : vector<8x32xf32> to vector<1x8x32xf32>
    %13 = tpu.concatenate %11, %12 in 0 : vector<1x8x32xf32>, vector<1x8x32xf32> -> vector<2x8x32xf32>
    %14 = vector.shape_cast %13 : vector<2x8x32xf32> to vector<16x32xf32>
    %cst_15 = arith.constant dense<0.000000e+00> : vector<16x128xf32>
    %15 = tpu.matmul %14, %1, %cst_15 {dimension_numbers = #tpu.dot_dimension_numbers<[1], [0], [0], [1], [0, 0, 1, 1], [], []>} : vector<16x32xf32>, vector<32x128xf32>, vector<16x128xf32> -> vector<16x128xf32>
    %16 = vector.shape_cast %15 : vector<16x128xf32> to vector<2x8x128xf32>
    %17 = vector.extract_strided_slice %16 {offsets = [0, 0, 0], sizes = [2, 3, 128], strides = [1, 1, 1]} : vector<2x8x128xf32> to vector<2x3x128xf32>
    %18 = vector.extract_strided_slice %16 {offsets = [0, 3, 0], sizes = [2, 1, 128], strides = [1, 1, 1]} : vector<2x8x128xf32> to vector<2x1x128xf32>
    %19 = vector.broadcast %18 : vector<2x1x128xf32> to vector<2x3x128xf32>
    %20 = arith.addf %17, %19 : vector<2x3x128xf32>
    %cst_16 = arith.constant 0.000000e+00 : f32
    %21 = vector.broadcast %cst_16 : f32 to vector<2x1x128xf32>
    %22 = tpu.concatenate %17, %20, %18, %21 in 1 : vector<2x3x128xf32>, vector<2x3x128xf32>, vector<2x1x128xf32>, vector<2x1x128xf32> -> vector<2x8x128xf32>
    %23 = vector.shape_cast %22 : vector<2x8x128xf32> to vector<16x128xf32>
    %24 = vector.broadcast %2 : vector<1x128xf32> to vector<16x128xf32>
    %25 = arith.addf %23, %24 : vector<16x128xf32>
    %cst_17 = arith.constant 0.000000e+00 : f32
    %26 = vector.broadcast %cst_17 : f32 to vector<16x128xf32>
    %27 = arith.maximumf %25, %26 : vector<16x128xf32>
    %cst_18 = arith.constant dense<0.000000e+00> : vector<16x128xf32>
    %28 = tpu.matmul %27, %3, %cst_18 {dimension_numbers = #tpu.dot_dimension_numbers<[1], [0], [0], [1], [0, 0, 1, 1], [], []>} : vector<16x128xf32>, vector<128x128xf32>, vector<16x128xf32> -> vector<16x128xf32>
    %29 = vector.broadcast %4 : vector<1x128xf32> to vector<16x128xf32>
    %30 = arith.addf %28, %29 : vector<16x128xf32>
    %31 = vector.shape_cast %30 : vector<16x128xf32> to vector<2x8x128xf32>
    %32 = vector.extract_strided_slice %31 {offsets = [0, 0, 0], sizes = [2, 1, 128], strides = [1, 1, 1]} : vector<2x8x128xf32> to vector<2x1x128xf32>
    %33 = vector.shape_cast %32 : vector<2x1x128xf32> to vector<2x128xf32>
    %34 = vector.extract_strided_slice %31 {offsets = [0, 1, 0], sizes = [2, 1, 128], strides = [1, 1, 1]} : vector<2x8x128xf32> to vector<2x1x128xf32>
    %35 = vector.shape_cast %34 : vector<2x1x128xf32> to vector<2x128xf32>
    %36 = vector.extract_strided_slice %31 {offsets = [0, 2, 0], sizes = [2, 1, 128], strides = [1, 1, 1]} : vector<2x8x128xf32> to vector<2x1x128xf32>
    %37 = vector.shape_cast %36 : vector<2x1x128xf32> to vector<2x128xf32>
    %38 = vector.extract_strided_slice %31 {offsets = [0, 3, 0], sizes = [2, 1, 128], strides = [1, 1, 1]} : vector<2x8x128xf32> to vector<2x1x128xf32>
    %39 = vector.shape_cast %38 : vector<2x1x128xf32> to vector<2x128xf32>
    %40 = vector.extract_strided_slice %31 {offsets = [0, 4, 0], sizes = [2, 1, 128], strides = [1, 1, 1]} : vector<2x8x128xf32> to vector<2x1x128xf32>
    %41 = vector.shape_cast %40 : vector<2x1x128xf32> to vector<2x128xf32>
    %42 = vector.extract_strided_slice %31 {offsets = [0, 5, 0], sizes = [2, 1, 128], strides = [1, 1, 1]} : vector<2x8x128xf32> to vector<2x1x128xf32>
    %43 = vector.shape_cast %42 : vector<2x1x128xf32> to vector<2x128xf32>
    %44 = vector.extract_strided_slice %31 {offsets = [0, 6, 0], sizes = [2, 1, 128], strides = [1, 1, 1]} : vector<2x8x128xf32> to vector<2x1x128xf32>
    %45 = vector.shape_cast %44 : vector<2x1x128xf32> to vector<2x128xf32>
    %cst_19 = arith.constant 0.000000e+00 : f32
    %46 = vector.broadcast %cst_19 : f32 to vector<2x128xf32>
    %47 = arith.addf %46, %33 : vector<2x128xf32>
    %48 = arith.addf %47, %35 : vector<2x128xf32>
    %49 = arith.addf %48, %37 : vector<2x128xf32>
    %50 = arith.addf %46, %37 : vector<2x128xf32>
    %51 = arith.addf %50, %35 : vector<2x128xf32>
    %52 = arith.addf %46, %51 : vector<2x128xf32>
    %53 = arith.addf %52, %39 : vector<2x128xf32>
    %54 = arith.addf %47, %50 : vector<2x128xf32>
    %55 = arith.addf %54, %41 : vector<2x128xf32>
    %56 = arith.addf %48, %46 : vector<2x128xf32>
    %57 = arith.addf %56, %43 : vector<2x128xf32>
    %58 = arith.addf %49, %45 : vector<2x128xf32>
    %59 = vector.shape_cast %53 : vector<2x128xf32> to vector<2x1x128xf32>
    %60 = vector.shape_cast %55 : vector<2x128xf32> to vector<2x1x128xf32>
    %61 = vector.shape_cast %57 : vector<2x128xf32> to vector<2x1x128xf32>
    %62 = vector.shape_cast %58 : vector<2x128xf32> to vector<2x1x128xf32>
    %63 = tpu.concatenate %59, %60, %61, %62 in 1 : vector<2x1x128xf32>, vector<2x1x128xf32>, vector<2x1x128xf32>, vector<2x1x128xf32> -> vector<2x4x128xf32>
    %c0_20 = arith.constant 0 : index
    %c0_21 = arith.constant 0 : index
    %c0_22 = arith.constant 0 : index
    %64 = vector.load %arg7[%c0_20, %c0_21, %c0_22] : memref<2x4x128xf32, #tpu.memory_space<vmem>>, vector<2x4x128xf32>
    tpu.vector_store %arg7[%c0_20, %c0_21, %c0_22], %63 {strides = array<i32>} : memref<2x4x128xf32, #tpu.memory_space<vmem>>, vector<2x4x128xf32>,
    return
  }
  func.func @transform_0(%arg0: i32) -> (i32, i32) {
    %c0_i32 = arith.constant 0 : i32
    %c0_i32_0 = arith.constant 0 : i32
    %c0_i32_1 = arith.constant 0 : i32
    return %c0_i32, %c0_i32_0 : i32, i32
  }
  func.func @transform_1(%arg0: i32) -> (i32, i32, i32) {
    %c0_i32 = arith.constant 0 : i32
    %c0_i32_0 = arith.constant 0 : i32
    %c0_i32_1 = arith.constant 0 : i32
    return %arg0, %c0_i32, %c0_i32_0 : i32, i32, i32
  }
  func.func @transform_2(%arg0: i32) -> (i32, i32) {
    %c0_i32 = arith.constant 0 : i32
    %c0_i32_0 = arith.constant 0 : i32
    %c0_i32_1 = arith.constant 0 : i32
    return %c0_i32, %c0_i32_0 : i32, i32
  }
  func.func @transform_3(%arg0: i32) -> (i32, i32) {
    %c0_i32 = arith.constant 0 : i32
    %c0_i32_0 = arith.constant 0 : i32
    %c0_i32_1 = arith.constant 0 : i32
    return %c0_i32, %c0_i32_0 : i32, i32
  }
  func.func @transform_4(%arg0: i32) -> (i32, i32) {
    %c0_i32 = arith.constant 0 : i32
    %c0_i32_0 = arith.constant 0 : i32
    %c0_i32_1 = arith.constant 0 : i32
    return %c0_i32, %c0_i32_0 : i32, i32
  }
  func.func @transform_5(%arg0: i32) -> (i32, i32) {
    %c0_i32 = arith.constant 0 : i32
    %c0_i32_0 = arith.constant 0 : i32
    %c0_i32_1 = arith.constant 0 : i32
    return %c0_i32, %c0_i32_0 : i32, i32
  }
  func.func @transform_6(%arg0: i32) -> (i32, i32, i32) {
    %c0_i32 = arith.constant 0 : i32
    %c0_i32_0 = arith.constant 0 : i32
    %c0_i32_1 = arith.constant 0 : i32
    return %arg0, %c0_i32, %c0_i32_0 : i32, i32, i32
  }
}

</mosaic_0001>

<bundles_post_ra>
// kernel: tpu_custom_call.1
= control target key start
LH: loop header
LB: loop body
LE: loop exit
PB: predicated region body
PF: predicated region fallthrough
CT: control target
= control target key end

     0   :  { %11 = vsyncpa [#allocation3], 0  ;;  %s1245_s0 = inlined_call_operand.hbm [shape: f32[8,8], index: 0, kind: input, shape index: {}]   ;;  %s1246_s1 = inlined_call_operand.hbm [shape: f32[8,8,32], index: 1, kind: input, shape index: {}]   ;;  %s1247_s2 = inlined_call_operand.hbm [shape: f32[32,128], index: 2, kind: input, shape index: {}]   ;;  %s1248_s3 = inlined_call_operand.vmem [shape: f32[1,128], index: 3, kind: input, shape index: {}]   ;;  %s1249_s4 = inlined_call_operand.hbm [shape: f32[128,128], index: 4, kind: input, shape index: {}]   ;;  %s1250_s5 = inlined_call_operand.vmem [shape: f32[1,128], index: 5, kind: input, shape index: {}]   ;;  %s1251_s6 = inlined_call_operand.hbm [shape: f32[8,4,128], index: 6, kind: output, shape index: {}]  }
   0x1   :  { %12 = vsyncpa [#allocation6], 0 }
   0x2   :  { %14 = vsyncpa [#allocation6 + $0x1], 0 }
   0x3   :  { %15 = vsyncpa [#allocation9], 0 }
   0x4   :  { %16 = vsyncpa [#allocation4], 0 }
   0x5   :  { %18 = vsyncpa [#allocation4 + $0x1], 0  ;;  %s1056_s21 = smov 0   ;;  %s1058_s22 = smov 0  }
   0x6   :  { %s1060_s23 = smov 0   ;;  %s1062_s24 = smov 0  }
   0x7 LB: > { %s1077_s25 = sadd.s32 4294967295, %s1012_s24   ;;  %s688_s26 = sadd.s32 4294967294, %s1012_s24   ;;  %s1012_s24 = sphi %s1062_s24, %s1265_s24   ;;  %s1008_s23 = sphi %s1060_s23, %s1264_s23   ;;  %s1004_s22 = sphi %s1058_s22, %s1263_s22   ;;  %s1000_s21 = sphi %s1056_s21, %s1262_s21  }
   0x8   : > { %p65_p0 = scmp.ne.s32.totalorder %s1004_s22, %s1000_s21  ;;  %p66_p1 = scmp.eq.s32.totalorder %s1077_s25, 0 }
   0x9   : > { %p173_p2 = scmp.eq.s32.totalorder %s1077_s25, 3  ;;  %p179_p3 = scmp.eq.s32.totalorder %s688_s26, 3 }
   0xa   : > { %p1086_p4 = por %p66_p1, %p65_p0  ;;  %p689_p5 = scmp.ge.s32.totalorder %s1012_s24, 1 }
   0xb   : > { %p1091_p6 = por %p179_p3, %p65_p0  ;;  %p186_p7 = scmp.lt.s32.totalorder %s1012_s24, 5 }
   0xc   : > { %s209_s7 = sshll.u32 %s1247_s2, 4  ;;  %s1014_s9 = smov [#allocation7]   ;;  %s210_s7 = int_to_ptr.hbm [resolvable:$true] %s209_s7 }
   0xd   : > { %p1099_p8 = pnand %p689_p5, %p186_p7  ;;  %s211_s10 = sshll.u32 %s1014_s9, 4  ;;  %s212_s10 = int_to_ptr.vmem [resolvable:$true] %s211_s10 }
   0xe   : > { %s198_s14 = sshll.u32 %s1245_s0, 4  ;;  %s1252_s15 = smov 128   ;;  %s199_s14 = int_to_ptr.hbm [resolvable:$true] %s198_s14 }
   0xf   : > { %p747_p9 = pneg %p1099_p8  ;;  %s1253_s16 = smov 8  }
  0x10   : > { %s1017_s17 = smov [#allocation2]   ;;  %s226_s26 = sshll.u32 %s1249_s4, 4  ;;  %s227_s26 = int_to_ptr.hbm [resolvable:$true] %s226_s26 }
  0x11   : > { %p1107_p10 = pnand %p747_p9, %p66_p1  ;;  %s200_s18 = sshll.u32 %s1017_s17, 4  ;;  %s201_s18 = int_to_ptr.vmem [resolvable:$true] %s200_s18 }
  0x12   : > { %s1018_s29 = smov [#allocation8]   ;;  %p59_p12 = scmp.ne.s32.totalorder %s1008_s23, %s1004_s22 }
  0x13   : > { %753 = dma.hbm_to_vmem [thread:$0]  (!%p1107_p10), %s210_s7, 512, %s212_s10, [#allocation6], %s1252_s15, %s1252_s15, %s1253_s16  }
  0x14   : > { %750 = dma.hbm_to_vmem [thread:$0]  (!%p1107_p10), %s199_s14, 128, %s201_s18, [#allocation3]  }
  0x15   : > { %s228_s30 = sshll.u32 %s1018_s29, 4  ;;  %s1125_s7 = sadd.s32 1, %s1012_s24   ;;  %s229_s30 = int_to_ptr.vmem [resolvable:$true] %s228_s30 }
  0x16   : > { %756 = dma.hbm_to_vmem [thread:$0]  (!%p1107_p10), %s227_s26, 2048, %s229_s30, [#allocation9], %s1252_s15, %s1252_s15, %s1253_s16  }
  0x17   : > { %s49_s9 = ssub.s32 %s1012_s24, %s1125_s7  ;;  %s52_s10 = sadd.s32 1, %s1008_s23 }
  0x18   : > { %p50_p11 = scmp.eq.s32.totalorder %s49_s9, 0  ;;  %p60_p13 = scmp.eq.s32.totalorder %s1012_s24, 0 }
  0x19   : > { %p768_p0 = scmp.lt.s32.totalorder %s1012_s24, 4  ;;  %p1144_p5 = por %p173_p2, %p59_p12 }
  0x1a   : > { %s1140_s12 = scalar_select %p50_p11, %s1008_s23, %s52_s10  }
  0x1b   : > { %p61_p3 = por %p60_p13, %p59_p12  ;;  %s245_s11 = sand.u32 1, %s1012_s24  }
  0x1c   : > { %s247_s14 = sand.u32 1, %s1008_s23   ;;  %s713_s18 = sshll.u32 %s1012_s24, 4 }
  0x1d   : > { %s694_s17 = sshll.u32 %s247_s14, 4  ;;  %s254_s26 = scalar_lea.hbm %s1246_s1, %s713_s18 }
  0x1e   : > { %s249_s29 = scalar_lea.vmem [#allocation5], %s694_s17  ;;  %s255_s9 = sshll.u32 %s254_s26, 4  ;;  %s256_s9 = int_to_ptr.hbm [resolvable:$true] %s255_s9 }
  0x1f   : > { %s257_s30 = sshll.u32 %s249_s29, 4  ;;  %p1156_p7 = pnand %p768_p0, %p61_p3  ;;  %s258_s30 = int_to_ptr.vmem [resolvable:$true] %s257_s30 }
  0x20   : > { %s246_s15 = scalar_lea.sflag [#allocation6], %s245_s11  ;;  %s904_s16 = sshra.s32 %s256_s9, 4  ;;  %s905_s16 = int_to_ptr.hbm [resolvable:$true] %s904_s16 }
  0x21   : > { %s906_s14 = scalar_lea.hbm %s905_s16, 16  ;;  %p908_p9 = pneg %p1156_p7 }
  0x22   : > { %p907_p2 = scmp.ne.s32.totalorder %s905_s16, %s906_s14  ;;  %s911_s19 = scalar_lea.hbm %s1246_s1, 64 }
  0x23   : > { %p912_p12 = scmp.lt.s32.totalorder %s905_s16, %s1246_s1  ;;  %p913_p13 = scmp.lt.s32.totalorder %s911_s19, %s906_s14 }
  0x24   : > { %p909_p10 = pnand %p908_p9, %p907_p2 }
  0x25   : > { %p914_p0 = por %p913_p13, %p912_p12 }
  0x26   : > { %p910_p11 = pneg %p909_p10 }
  0x28   : > { %p915_p3 = pnand %p914_p0, %p910_p11 }
  0x2a   : > { %918 = shalt.err (!%p915_p3)
}
  0x2b   : > { %s1260_s11 = smov 8   ;;  %s1261_s29 = smov 128  }
  0x2c   : > { %760 = dma.hbm_to_vmem [thread:$0]  (!%p1156_p7), %s256_s9, 256, %s258_s30, %s246_s15, %s1261_s29, %s1261_s29, %s1260_s11  }
  0x2d   : > { %269 = sbr.rel (%p1099_p8) target bundleno = 489 (0x1e9), region = 44 }
  0x32   : > { %979 = dma.done.wait (%p66_p1), [#allocation3], 128  }
  0x33   : > { %981 = vsyncadd (%p66_p1), [#allocation3], 4294967168  ;;  %s276_s16 = sand.u32 1, %s1077_s25   ;;  %s1181_s14 = sand.u32 1, %s1004_s22  }
  0x34   : > { %s699_s10 = sshll.u32 %s1181_s14, 4  ;;  %s277_s17 = scalar_lea.sflag [#allocation6], %s276_s16 }
  0x35   : > { %s280_s18 = scalar_lea.vmem [#allocation5], %s699_s10 }
  0x36   : > { %983 = dma.done.wait (%p1086_p4), %s277_s17, 256  }
  0x37   : > { %985 = vsyncadd (%p1086_p4), %s277_s17, 4294967040 }
  0x38   : > { %987 = dma.done.wait (%p66_p1), [#allocation6], 512  }
  0x39   : > { %989 = vsyncadd (%p66_p1), [#allocation6], 4294966784 }
  0x3a   : > { %991 = dma.done.wait (%p66_p1), [#allocation9], 2048  }
  0x3b   : > { %993 = vsyncadd (%p66_p1), [#allocation9], 4294965248  ;;  %vm346_vm0 = vcmask 64512   ;;  %v345_v0 = vld [vmem:[%s280_s18] sm:$0xff]  ;;  %v322_v1 = vld [vmem:[#allocation2] sm:$0xff]  ;;  %vm392_vm1 = vcmask 261120  }
  0x3c   : > { %v704_v2 = vld [vmem:[%s280_s18 + $0x8] sm:$0xff]  ;;  %365 = vmatpush.msra.mxu1 %v345_v0  ;;  %v325_v4 = vld [vmem:[#allocation7 + $0x10] sm:$0xff]  ;;  %v323_v6 = vld [vmem:[#allocation7] sm:$0xff]  ;;  %vm438_vm2 = vcmask 1042432   ;;  %vm441_vm3 = vcmask 1045504   ;;  %vm444_vm4 = vcmask 1046528  }
  0x3d   : > { %v326_v3 = vld [vmem:[#allocation7 + $0x18] sm:$0xff]  ;;  %703 = vmatmul.msk.f32.vlgmr.msra.gmra.mxu1 %vm346_vm0, %v322_v1  ;;  %v324_v5 = vld [vmem:[#allocation7 + $0x8] sm:$0xff]  ;;  %v342_v8 = vld [vmem:[#allocation8 + $0x70] sm:$0xff]  ;;  %s702_s9 = sshll.u32 %s1181_s14, 3  ;;  %vm558_vm5 = vcmask 1040384   ;;  %vm561_vm6 = vcmask 1041408  }
  0x3e   : > { %411 = vmatpush.msra.mxu2 %v326_v3  ;;  %387 = vmatpush.msrb.mxu1 %v704_v2  ;;  %v343_v7 = vld [vmem:[#allocation8 + $0x78] sm:$0xff]  ;;  %v341_v9 = vld [vmem:[#allocation8 + $0x68] sm:$0xff]  ;;  %v340_v10 = vld [vmem:[#allocation8 + $0x60] sm:$0xff]  ;;  %s319_s19 = scalar_lea.vmem [#allocation10], %s702_s9  ;;  %s714_s20 = sshll.u32 %s1077_s25, 3 }
  0x3f   : > { %457 = vmatpush.msra.mxu0 %v343_v7  ;;  %715 = vmatpush.msra.mxu3 %v343_v7  ;;  %v339_v11 = vld [vmem:[#allocation8 + $0x58] sm:$0xff]  ;;  %v338_v12 = vld [vmem:[#allocation8 + $0x50] sm:$0xff]  ;;  %v337_v13 = vld [vmem:[#allocation8 + $0x48] sm:$0xff]  ;;  %s580_s29 = scalar_lea.hbm %s1251_s6, %s714_s20  ;;  %s581_s16 = sshll.u32 %s319_s19, 4  ;;  %s582_s16 = int_to_ptr.vmem [resolvable:$true] %s581_s16 }
  0x40   : > { %412 = vmatpush.msra.mxu2 %v325_v4  ;;  %v336_v14 = vld [vmem:[#allocation8 + $0x40] sm:$0xff]  ;;  %v335_v15 = vld [vmem:[#allocation8 + $0x38] sm:$0xff]  ;;  %v334_v18 = vld [vmem:[#allocation8 + $0x30] sm:$0xff]  ;;  %s583_s25 = sshll.u32 %s580_s29, 4  ;;  %s569_s10 = scalar_lea.sflag [#allocation4], %s1181_s14  ;;  %s584_s25 = int_to_ptr.hbm [resolvable:$true] %s583_s25 }
  0x41   : > { %458 = vmatpush.msra.mxu0 %v342_v8  ;;  %716 = vmatpush.msra.mxu3 %v342_v8  ;;  %v333_v19 = vld [vmem:[#allocation8 + $0x28] sm:$0xff]  ;;  %v332_v20 = vld [vmem:[#allocation8 + $0x20] sm:$0xff]  ;;  %v331_v21 = vld [vmem:[#allocation8 + $0x18] sm:$0xff]  ;;  %s948_s17 = sshra.s32 %s584_s25, 4  ;;  %s954_s15 = scalar_lea.hbm %s1251_s6, 32  ;;  %s949_s17 = int_to_ptr.hbm [resolvable:$true] %s948_s17 }
  0x42   : > { %413 = vmatpush.msra.mxu2 %v324_v5  ;;  %v330_v22 = vld [vmem:[#allocation8 + $0x10] sm:$0xff]  ;;  %v329_v23 = vld [vmem:[#allocation8 + $0x8] sm:$0xff]  ;;  %v328_v24 = vld [vmem:[#allocation8] sm:$0xff]  ;;  %s950_s18 = scalar_lea.hbm %s949_s17, 8  ;;  %p955_p7 = scmp.lt.s32.totalorder %s949_s17, %s1251_s6 }
  0x43   : > { %459 = vmatpush.msra.mxu0 %v341_v9  ;;  %717 = vmatpush.msra.mxu3 %v341_v9  ;;  %v812_v30 = vld [vmem:[%s1248_s3] ss:$0 sm:$0xff]  ;;  %p951_p1 = scmp.ne.s32.totalorder %s949_s17, %s950_s18  ;;  %p956_p2 = scmp.lt.s32.totalorder %s954_s15, %s950_s18 }
  0x44   : > { %414 = vmatpush.msra.mxu2 %v323_v6  ;;  %v813_v46 = vld [vmem:[%s1250_s5] ss:$0 sm:$0xff] }
  0x45   : > { %705 = vmatmul.msk.f32.vlgmr.msrb.gmra.mxu1 %vm346_vm0, %v322_v1  ;;  %460 = vmatpush.msra.mxu0 %v340_v10  ;;  %p952_p4 = pnand %p951_p1, %p1144_p5  ;;  %p957_p9 = por %p956_p2, %p955_p7 }
  0x46   : > { %718 = vmatpush.msra.mxu3 %v340_v10 }
  0x47   : > { %461 = vmatpush.msra.mxu0 %v339_v11  ;;  %p953_p8 = pneg %p952_p4 }
  0x48   : > { %719 = vmatpush.msra.mxu3 %v339_v11 }
  0x49   : > { %462 = vmatpush.msra.mxu0 %v338_v12  ;;  %p958_p10 = pnand %p957_p9, %p953_p8 }
  0x4a   : > { %720 = vmatpush.msra.mxu3 %v338_v12 }
  0x4b   : > { %463 = vmatpush.msra.mxu0 %v337_v13 }
  0x4c   : > { %721 = vmatpush.msra.mxu3 %v337_v13 }
  0x4d   : > { %464 = vmatpush.msra.mxu0 %v336_v14 }
  0x4e   : > { %722 = vmatpush.msra.mxu3 %v336_v14 }
  0x4f   : > { %465 = vmatpush.msra.mxu0 %v335_v15 }
  0x50   : > { %723 = vmatpush.msra.mxu3 %v335_v15 }
  0x51   : > { %466 = vmatpush.msra.mxu0 %v334_v18 }
  0x52   : > { %724 = vmatpush.msra.mxu3 %v334_v18 }
  0x53   : > { %467 = vmatpush.msra.mxu0 %v333_v19 }
  0x54   : > { %725 = vmatpush.msra.mxu3 %v333_v19 }
  0x55   : > { %468 = vmatpush.msra.mxu0 %v332_v20 }
  0x56   : > { %726 = vmatpush.msra.mxu3 %v332_v20 }
  0x57   : > { %469 = vmatpush.msra.mxu0 %v331_v21 }
  0x58   : > { %727 = vmatpush.msra.mxu3 %v331_v21 }
  0x59   : > { %470 = vmatpush.msra.mxu0 %v330_v22 }
  0x5a   : > { %728 = vmatpush.msra.mxu3 %v330_v22 }
  0x5b   : > { %471 = vmatpush.msra.mxu0 %v329_v23 }
  0x5c   : > { %729 = vmatpush.msra.mxu3 %v329_v23 }
  0x5d   : > { %472 = vmatpush.msra.mxu0 %v328_v24 }
  0x5e   : > { %730 = vmatpush.msra.mxu3 %v328_v24 }
  0xba   : > { %v367_v16 = vpop.f32.mrf.mxu1 }
  0xbb   : > { %706 = vmatmul.msk.f32.vlgmr.msra.gmra.mxu2 %vm392_vm1, %v367_v16 }
  0xc2   : > { %v389_v17 = vpop.f32.mrf.mxu1 }
  0xc3   : > { %707 = vmatmul.msk.f32.gmra.mxu2 %vm392_vm1, %v389_v17 }
 0x13e   : > { %v416_v25 = vpop.f32.mrf.mxu2 }
 0x13f   : > { %v422_v26 = vperm.slane %v416_v25, 3  ;;  %v434_v29 = vrot.slane %v416_v25, 5 }
 0x141   : > { %v424_v27 = vadd.f32 %v422_v26, %v416_v25 }
 0x143   : > { %v428_v28 = vrot.slane %v424_v27, 5 }
 0x145   : > { %v439_v31 = vsel %vm438_vm2, %v416_v25, %v428_v28 }
 0x146   : > { %v419_v32 = vpop.f32.mrf.mxu2  ;;  %v442_v33 = vsel %vm441_vm3, %v439_v31, %v434_v29 }
 0x147   : > { %v423_v34 = vperm.slane %v419_v32, 3  ;;  %v445_v35 = vsel %vm444_vm4, %v442_v33, 0.0  ;;  %v435_v40 = vrot.slane %v419_v32, 5 }
 0x148   : > { %v450_v36 = vadd.f32 %v812_v30, %v445_v35 }
 0x149   : > { %v425_v37 = vadd.f32 %v423_v34, %v419_v32 }
 0x14a   : > { %v452_v38 = vmax.f32 %v450_v36, 0.0 }
 0x14b   : > { %v429_v39 = vrot.slane %v425_v37, 5 }
 0x14c   : > { %473 = vmatmul.f32.vlgmr.msra.gmra.mxu0 %v452_v38 }
 0x14d   : > { %v440_v41 = vsel %vm438_vm2, %v419_v32, %v429_v39 }
 0x14e   : > { %v443_v42 = vsel %vm441_vm3, %v440_v41, %v435_v40 }
 0x14f   : > { %v446_v43 = vsel %vm444_vm4, %v443_v42, 0.0 }
 0x150   : > { %v451_v44 = vadd.f32 %v812_v30, %v446_v43 }
 0x152   : > { %v453_v45 = vmax.f32 %v451_v44, 0.0 }
 0x154   : > { %476 = vmatmul.f32.vlgmr.msra.gmra.mxu3 %v453_v45 }
 0x1c9   : > { %v474_v47 = vpop.f32.mrf.mxu0 }
 0x1ca   : > { %v475_v48 = vadd.f32 %v813_v46, %v474_v47 }
 0x1cc   : > { %v484_v49 = vrot.slane %v475_v48, 1  ;;  %v490_v50 = vrot.slane %v475_v48, 2  ;;  %v496_v51 = vrot.slane %v475_v48, 7  ;;  %v514_v52 = vrot.slane %v475_v48, 4 }
 0x1cd   : > { %v522_v56 = vrot.slane %v475_v48, 5  ;;  %v528_v57 = vrot.slane %v475_v48, 6 }
 0x1ce   : > { %v488_v53 = vadd.f32 %v484_v49, %v475_v48  ;;  %v500_v54 = vadd.f32 %v496_v51, %v475_v48  ;;  %v512_v55 = vadd.f32 %v490_v50, %v475_v48 }
 0x1d0   : > { %v494_v58 = vadd.f32 %v490_v50, %v488_v53  ;;  %v504_v59 = vadd.f32 %v500_v54, %v484_v49  ;;  %v518_v60 = vadd.f32 %v514_v52, %v512_v55  ;;  %v526_v61 = vadd.f32 %v522_v56, %v488_v53 }
 0x1d2   : > { %v532_v62 = vadd.f32 %v528_v57, %v494_v58  ;;  %v536_v63 = vrot.slane %v504_v59, 2  ;;  %v542_v0 = vrot.slane %v518_v60, 7  ;;  %v548_v1 = vrot.slane %v526_v61, 6 }
 0x1d4   : > { %v554_v2 = vrot.slane %v532_v62, 5  ;;  %v559_v3 = vsel %vm558_vm5, %v536_v63, %v542_v0 }
 0x1d5   : > { %v562_v4 = vsel %vm561_vm6, %v559_v3, %v548_v1 }
 0x1d6   : > { %v564_v5 = vsel %vm438_vm2, %v562_v4, %v554_v2 }
 0x1d7   : > { %v477_v6 = vpop.f32.mrf.mxu3  ;;  %566 = vst [vmem:[%s319_s19] sm:$0xf] %v564_v5 }
 0x1d8   : > { %v478_v7 = vadd.f32 %v813_v46, %v477_v6 }
 0x1da   : > { %v485_v8 = vrot.slane %v478_v7, 1  ;;  %v491_v9 = vrot.slane %v478_v7, 2  ;;  %v497_v10 = vrot.slane %v478_v7, 7  ;;  %v515_v11 = vrot.slane %v478_v7, 4 }
 0x1db   : > { %v523_v15 = vrot.slane %v478_v7, 5  ;;  %v529_v16 = vrot.slane %v478_v7, 6 }
 0x1dc   : > { %v489_v12 = vadd.f32 %v485_v8, %v478_v7  ;;  %v501_v13 = vadd.f32 %v497_v10, %v478_v7  ;;  %v513_v14 = vadd.f32 %v491_v9, %v478_v7 }
 0x1de   : > { %v495_v17 = vadd.f32 %v491_v9, %v489_v12  ;;  %v505_v18 = vadd.f32 %v501_v13, %v485_v8  ;;  %v519_v19 = vadd.f32 %v515_v11, %v513_v14  ;;  %v527_v20 = vadd.f32 %v523_v15, %v489_v12 }
 0x1e0   : > { %v533_v21 = vadd.f32 %v529_v16, %v495_v17  ;;  %v537_v22 = vrot.slane %v505_v18, 2  ;;  %v543_v23 = vrot.slane %v519_v19, 7  ;;  %v549_v24 = vrot.slane %v527_v20, 6 }
 0x1e2   : > { %v555_v25 = vrot.slane %v533_v21, 5  ;;  %v560_v26 = vsel %vm558_vm5, %v537_v22, %v543_v23 }
 0x1e3   : > { %v563_v27 = vsel %vm561_vm6, %v560_v26, %v549_v24 }
 0x1e4   : > { %v565_v28 = vsel %vm438_vm2, %v563_v27, %v555_v25 }
 0x1e5   : > { %567 = vst [vmem:[%s319_s19 + $0x4] sm:$0xf] %v565_v28 }
 0x1e6   : > { %961 = shalt.err (!%p958_p10)
}
 0x1e7   : > { %s1019_s14 = smov 64   ;;  %s1020_s19 = smov 4  }
 0x1e8   : > { %745 = dma.vmem_to_hbm [thread:$0]  (%p1144_p5), %s582_s16, 128, %s584_s25, %s569_s10, %s1019_s14, %s1019_s14, %s1020_s19  }
 0x1e9 PF: > { %p772_p11 = scmp.ge.s32.totalorder %s1012_s24, 2  ;;  %s598_s20 = sand.u32 1, %s1000_s21  }
 0x1ea   : > { %s599_s26 = scalar_lea.sflag [#allocation4], %s598_s20 }
 0x1eb   : > { %p762_p12 = pnand %p772_p11, %p1091_p6 }
 0x1ed   : > { %p763_p13 = pneg %p762_p12 }
 0x1ef   : > { %995 = dma.done.wait (%p763_p13), %s599_s26, 128  }
 0x1f0   : > { %997 = vsyncadd (%p763_p13), %s599_s26, 4294967168  ;;  %p21_p0 = scmp.ge.s32.totalorder %s1125_s7, 6   ;;  %s1262_s21 = smov %s1004_s22 }
 0x1f1   : > { %s1263_s22 = smov %s1008_s23  ;;  %s1264_s23 = smov %s1140_s12 }
 0x1f2   : > { %s1265_s24 = smov %s1125_s7  ;;  %23 = sbr.rel (!%p21_p0) target bundleno = 7 (0x7), region = 103 }
 0x1f7   :  { %605 = vsyncpa [#allocation3], 1 }
 0x1f8   :  { %607 = vsyncpa [#allocation3 + $0x1], 1 }
 0x1f9   :  { %608 = vsyncpa [#allocation6], 1 }
 0x1fa   :  { %610 = vsyncpa [#allocation6 + $0x1], 1 }
 0x1fb   :  { %611 = vsyncpa [#allocation9], 1 }
 0x1fc   :  { %612 = vsyncpa [#allocation4], 1 }
 0x1fd   :  { %614 = vsyncpa [#allocation4 + $0x1], 1 }

</bundles_post_ra>
